<compile_context>
chip_gen: v6e
topology: v6e:2x2x1
jax: 0.10.0
libtpu: 0.0.40
codegen_flags: <defaults>
</compile_context>

<pallas_src>
import functools

import jax
import jax.numpy as jnp
from jax.experimental import pallas as pl
from jax.experimental.pallas import tpu as pltpu


def _focal_kernel(logits_ref, tgt_ref, out_ref, *,
                  alpha, gamma, ignore_index, hw, ts, spp, full_tiles, needs_mask):
    s = pl.program_id(2)

    @pl.when(s == 0)
    def _():
        out_ref[...] = jnp.zeros_like(out_ref)

    x = logits_ref[...].astype(jnp.float32)            # (1, C, ts)
    t = tgt_ref[...]                                    # (1, 1, ts) int32

    # --- softmax pieces: one exp pass over the C x ts tile (reused for S and e_t) ---
    m = jnp.max(x, axis=1, keepdims=True)               # (1, 1, ts)
    z = x - m
    ez = jnp.exp(z)                                      # (1, C, ts)  single EUP pass
    ssum = jnp.sum(ez, axis=1, keepdims=True)            # (1, 1, ts)  >= 1
    cls = jax.lax.broadcasted_iota(jnp.int32, x.shape, 1)
    e_t = jnp.sum(jnp.where(cls == t, ez, 0.0), axis=1, keepdims=True)

    # pt = softmax prob of the target class.  Upper clamp keeps loss >= 0 under
    # rounding; lower clamp keeps -log finite if e_t underflows (extreme logit spread).
    pt = jnp.clip(e_t / ssum, 1e-37, 1.0)

    # Cross entropy per column (= logsumexp - x_t); ignored pixels contribute 0.
    keep = t != ignore_index
    loss = jnp.where(keep, -jnp.log(pt), 0.0)            # (1, 1, ts)

    # --- focal modulation: alpha * (1 - pt)^gamma * loss ---
    omp = 1.0 - pt                                       # in [0, 1)
    g = float(gamma)
    if g.is_integer() and 0.0 <= g <= 8.0:
        mod = jnp.ones_like(omp)
        for _ in range(int(g)):                          # gamma=2 -> square, no pow
            mod = mod * omp
    else:
        mod = omp ** g
    focal = (alpha * mod) * loss                         # 0 wherever loss == 0

    if needs_mask:
        # Only ragged / padded tail tiles pay for the column mask.
        g_idx = pl.program_id(1) * spp + s               # logical spatial tile index

        @pl.when(g_idx < full_tiles)
        def _():
            out_ref[...] += focal

        @pl.when(g_idx >= full_tiles)
        def _():
            col = jax.lax.broadcasted_iota(jnp.int32, focal.shape, 2)
            valid = hw - g_idx * ts                      # <= 0 for fully padded tiles
            out_ref[...] += jnp.where(col < valid, focal, 0.0)
    else:
        out_ref[...] += focal                            # lane-wise partial sums


def _vmem_budgets(block_bytes, vmem_limit_bytes):
    """Generation-aware defaults: smaller tiles/limit on 64 MiB (v7x) parts."""
    try:
        cap = int(getattr(pltpu.get_tpu_info(), "vmem_capacity_bytes", 0))
    except Exception:
        cap = 0
    if cap >= (96 << 20):                    # v5e / v6e: 128 MiB VMEM
        bb, vl = 4 << 20, 64 << 20
    else:                                    # v7x (64 MiB) or unknown: conservative
        bb, vl = 2 << 20, 40 << 20
    return (bb if block_bytes is None else int(block_bytes),
            vl if vmem_limit_bytes is None else int(vmem_limit_bytes))


def focal_loss_pallas(logits_nchw, targets_nhw, *, alpha=1.0, gamma=2.0,
                      ignore_index=255, reduction='mean',
                      block_bytes=None, vmem_limit_bytes=None):
    """logits_nchw: (N, C, H, W) float (f32/bf16); targets_nhw: (N, H, W) int."""
    # TODO(synk): per-class `weight=` of CrossEntropyLoss is not implemented (module default None).
    N, C, H, W = logits_nchw.shape
    HW = H * W

    block_bytes, vmem_limit_bytes = _vmem_budgets(block_bytes, vmem_limit_bytes)

    # Free views; no transpose, and no dtype-cast HBM pass for int32 targets.
    logits = logits_nchw.reshape(N, C, HW)
    if targets_nhw.dtype != jnp.int32:
        targets_nhw = targets_nhw.astype(jnp.int32)      # only pays when not int32
    targets = targets_nhw.reshape(N, 1, HW)

    # --- lane-dense spatial tile size ---
    # VMEM bytes per lane: logits (double-buffered, C padded to 8 sublanes) +
    # int32 targets (double-buffered, sublane dim 1 pads to 8) + resident f32 output.
    padded_c = -(-C // 8) * 8
    per_lane = 2 * padded_c * logits.dtype.itemsize + 2 * 8 * 4 + 8 * 4
    ts = min(block_bytes // per_lane, 16384)             # cap so the grid doesn't collapse
    ts = max(128, (ts // 128) * 128)
    if HW <= ts:
        ts = HW                                          # one block == full spatial extent
    else:
        ts_steps = (HW // 8 // 128) * 128                # aim for >= ~8 pipeline steps
        if ts_steps >= 512:                              # never below DMA-efficient 512 lanes
            ts = min(ts, ts_steps)

    s_tiles = pl.cdiv(HW, ts)
    P = 2 if s_tiles >= 2 else 1                         # spatial "parallel" axis (v7x megacore)
    spp = pl.cdiv(s_tiles, P)
    total_tiles = P * spp
    full_tiles = HW // ts
    needs_mask = (HW % ts != 0) or (total_tiles != s_tiles)

    def spatial_block(p, s):
        g = p * spp + s
        if total_tiles != s_tiles:                       # clamp padded super-tile overflow
            g = jnp.minimum(g, s_tiles - 1)
        return g

    kernel = functools.partial(
        _focal_kernel, alpha=float(alpha), gamma=float(gamma),
        ignore_index=int(ignore_index), hw=HW, ts=ts, spp=spp,
        full_tiles=full_tiles, needs_mask=needs_mask)

    partials = pl.pallas_call(
        kernel,
        out_shape=jax.ShapeDtypeStruct((N * P, 1, ts), jnp.float32),
        grid_spec=pltpu.PrefetchScalarGridSpec(
            num_scalar_prefetch=0,
            grid=(N, P, spp),
            in_specs=[
                pl.BlockSpec((1, C, ts), lambda n, p, s: (n, 0, spatial_block(p, s))),
                pl.BlockSpec((1, 1, ts), lambda n, p, s: (n, 0, spatial_block(p, s))),
            ],
            out_specs=pl.BlockSpec((1, 1, ts), lambda n, p, s: (n * P + p, 0, 0)),
        ),
        compiler_params=pltpu.CompilerParams(
            dimension_semantics=("parallel", "parallel", "arbitrary"),
            vmem_limit_bytes=int(vmem_limit_bytes)),
    )(logits, targets)

    total = jnp.sum(partials)
    if reduction == 'mean':
        # PyTorch FocalLoss does .mean() on the per-pixel loss -> divide by N*H*W
        # (ignored pixels are counted in the denominator with value 0).
        return total / jnp.float32(N * HW)
    elif reduction == 'sum':
        return total
    else:
        # TODO(synk): reduction='none' (per-pixel output) path not implemented.
        raise NotImplementedError(f"reduction={reduction!r}")


def focal_loss_ref(logits_nchw, targets_nhw, *, alpha=1.0, gamma=2.0,
                   ignore_index=255):
    """Pure-JAX reference replicating PyTorch FocalLoss forward (reduction='mean')."""
    N, C, H, W = logits_nchw.shape
    x = jnp.transpose(logits_nchw, (0, 2, 3, 1)).reshape(-1, C).astype(jnp.float32)
    t = targets_nhw.reshape(-1).astype(jnp.int32)
    lse = jax.scipy.special.logsumexp(x, axis=-1)
    t_safe = jnp.where(t == ignore_index, 0, t)
    x_t = jnp.take_along_axis(x, t_safe[:, None], axis=-1)[:, 0]
    loss = lse - x_t
    loss = jnp.where(t == ignore_index, 0.0, loss)
    pt = jnp.exp(-loss)
    focal = alpha * (1.0 - pt) ** gamma * loss
    return jnp.mean(focal)


if __name__ == "__main__":
    key = jax.random.PRNGKey(0)
    k1, k2, k3, k4 = jax.random.split(key, 4)

    # --- primary check: small NCHW segmentation-style shapes ---
    N, C, H, W = 2, 4, 16, 16
    logits = jax.random.normal(k1, (N, C, H, W), dtype=jnp.float32)
    targets = jax.random.randint(k2, (N, H, W), 0, C, dtype=jnp.int32)
    targets = targets.at[0, :2, :4].set(255)            # some ignore_index pixels

    out = focal_loss_pallas(logits, targets)
    out = jax.block_until_ready(out)
    ref = focal_loss_ref(logits, targets)
    assert jnp.allclose(out, ref, rtol=1e-5, atol=1e-5), (out, ref)

    # --- secondary check: exercises multi-tile grid, P=2 spatial axis, ragged tail ---
    N2, C2, H2, W2 = 1, 5, 130, 130
    logits2 = jax.random.normal(k3, (N2, C2, H2, W2), dtype=jnp.float32)
    targets2 = jax.random.randint(k4, (N2, H2, W2), 0, C2, dtype=jnp.int32)
    targets2 = targets2.at[0, :3, :7].set(255)

    out2 = jax.block_until_ready(focal_loss_pallas(logits2, targets2))
    ref2 = focal_loss_ref(logits2, targets2)
    assert jnp.allclose(out2, ref2, rtol=1e-5, atol=1e-5), (out2, ref2)

    print("KERNEL_OK")
</pallas_src>

<mosaic_0001>
module attributes {stable_mosaic.version = 11 : i64} {
  func.func @_focal_kernel(%arg0: i32, %arg1: i32, %arg2: i32, %arg3: memref<1x4x256xf32, #tpu.memory_space<vmem>>, %arg4: memref<1x1x256xi32, #tpu.memory_space<vmem>>, %arg5: memref<1x1x256xf32, #tpu.memory_space<vmem>>) attributes {dimension_semantics = [#tpu.dimension_semantics<parallel>, #tpu.dimension_semantics<parallel>, #tpu.dimension_semantics<arbitrary>], iteration_bounds = array<i64: 2, 1, 1>, scalar_prefetch = 0 : i64, scratch_operands = 0 : i64, tpu.core_type = #tpu.core_type<tc>, window_params = [{transform_indices = @transform_0, window_bounds = array<i64: 1, 4, 256>}, {transform_indices = @transform_1, window_bounds = array<i64: 1, 1, 256>}, {transform_indices = @transform_2, window_bounds = array<i64: 1, 1, 256>}]} {
    %c0_i32 = arith.constant 0 : i32
    %0 = arith.cmpi eq, %arg2, %c0_i32 : i32
    %1 = arith.extui %0 : i1 to i32
    %c0_i32_0 = arith.constant 0 : i32
    %2 = arith.cmpi ne, %1, %c0_i32_0 : i32
    scf.if %2 {
      %cst_22 = arith.constant 0.000000e+00 : f32
      %42 = vector.broadcast %cst_22 : f32 to vector<1x1x256xf32>
      %c0_23 = arith.constant 0 : index
      %c0_24 = arith.constant 0 : index
      %c0_25 = arith.constant 0 : index
      %43 = vector.load %arg5[%c0_23, %c0_24, %c0_25] : memref<1x1x256xf32, #tpu.memory_space<vmem>>, vector<1x1x256xf32>
      tpu.vector_store %arg5[%c0_23, %c0_24, %c0_25], %42 {strides = array<i32>} : memref<1x1x256xf32, #tpu.memory_space<vmem>>, vector<1x1x256xf32>,
    } else {
    }
    %c0 = arith.constant 0 : index
    %c0_1 = arith.constant 0 : index
    %c0_2 = arith.constant 0 : index
    %3 = vector.load %arg3[%c0, %c0_1, %c0_2] : memref<1x4x256xf32, #tpu.memory_space<vmem>>, vector<1x4x256xf32>
    %c0_3 = arith.constant 0 : index
    %c0_4 = arith.constant 0 : index
    %c0_5 = arith.constant 0 : index
    %4 = vector.load %arg4[%c0_3, %c0_4, %c0_5] : memref<1x1x256xi32, #tpu.memory_space<vmem>>, vector<1x1x256xi32>
    %cst = arith.constant dense<0xFF800000> : vector<1x256xf32>
    %5 = vector.multi_reduction <maximumf>, %3, %cst [1] : vector<1x4x256xf32> to vector<1x256xf32>
    %6 = vector.shape_cast %5 : vector<1x256xf32> to vector<1x1x256xf32>
    %7 = vector.broadcast %6 : vector<1x1x256xf32> to vector<1x4x256xf32>
    %8 = arith.subf %3, %7 : vector<1x4x256xf32>
    %9 = math.exp %8 : vector<1x4x256xf32>
    %cst_6 = arith.constant dense<0.000000e+00> : vector<1x256xf32>
    %10 = vector.multi_reduction <add>, %9, %cst_6 [1] : vector<1x4x256xf32> to vector<1x256xf32>
    %11 = vector.shape_cast %10 : vector<1x256xf32> to vector<1x1x256xf32>
    %12 = tpu.iota {dimensions = array<i32: 1>} : vector<1x4x256xi32>
    %13 = vector.broadcast %4 : vector<1x1x256xi32> to vector<1x4x256xi32>
    %14 = arith.cmpi eq, %12, %13 : vector<1x4x256xi32>
    %cst_7 = arith.constant 0.000000e+00 : f32
    %15 = vector.broadcast %cst_7 : f32 to vector<1x4x256xf32>
    %16 = arith.select %14, %9, %15 : vector<1x4x256xi1>, vector<1x4x256xf32>
    %cst_8 = arith.constant dense<0.000000e+00> : vector<1x256xf32>
    %17 = vector.multi_reduction <add>, %16, %cst_8 [1] : vector<1x4x256xf32> to vector<1x256xf32>
    %18 = vector.shape_cast %17 : vector<1x256xf32> to vector<1x1x256xf32>
    %19 = arith.divf %18, %11 : vector<1x1x256xf32>
    %cst_9 = arith.constant 9.99999991E-38 : f32
    %cst_10 = arith.constant 1.000000e+00 : f32
    %20 = vector.broadcast %cst_9 : f32 to vector<1x1x256xf32>
    %21 = arith.maximumf %20, %19 : vector<1x1x256xf32>
    %22 = vector.broadcast %cst_10 : f32 to vector<1x1x256xf32>
    %23 = arith.minimumf %22, %21 : vector<1x1x256xf32>
    %c255_i32 = arith.constant 255 : i32
    %24 = vector.broadcast %c255_i32 : i32 to vector<1x1x256xi32>
    %25 = arith.cmpi ne, %4, %24 : vector<1x1x256xi32>
    %26 = math.log %23 : vector<1x1x256xf32>
    %cst_11 = arith.constant 0.000000e+00 : f32
    %27 = vector.broadcast %cst_11 : f32 to vector<1x1x256xf32>
    %28 = arith.subf %27, %26 : vector<1x1x256xf32>
    %cst_12 = arith.constant 0.000000e+00 : f32
    %29 = vector.broadcast %cst_12 : f32 to vector<1x1x256xf32>
    %30 = arith.select %25, %28, %29 : vector<1x1x256xi1>, vector<1x1x256xf32>
    %cst_13 = arith.constant 1.000000e+00 : f32
    %31 = vector.broadcast %cst_13 : f32 to vector<1x1x256xf32>
    %32 = arith.subf %31, %23 : vector<1x1x256xf32>
    %cst_14 = arith.constant 1.000000e+00 : f32
    %33 = vector.broadcast %cst_14 : f32 to vector<1x1x256xf32>
    %34 = arith.mulf %33, %32 : vector<1x1x256xf32>
    %35 = arith.mulf %34, %32 : vector<1x1x256xf32>
    %cst_15 = arith.constant 1.000000e+00 : f32
    %36 = vector.broadcast %cst_15 : f32 to vector<1x1x256xf32>
    %37 = arith.mulf %36, %35 : vector<1x1x256xf32>
    %38 = arith.mulf %37, %30 : vector<1x1x256xf32>
    %c0_16 = arith.constant 0 : index
    %c0_17 = arith.constant 0 : index
    %c0_18 = arith.constant 0 : index
    %39 = vector.load %arg5[%c0_16, %c0_17, %c0_18] : memref<1x1x256xf32, #tpu.memory_space<vmem>>, vector<1x1x256xf32>
    %40 = arith.addf %39, %38 : vector<1x1x256xf32>
    %c0_19 = arith.constant 0 : index
    %c0_20 = arith.constant 0 : index
    %c0_21 = arith.constant 0 : index
    %41 = vector.load %arg5[%c0_19, %c0_20, %c0_21] : memref<1x1x256xf32, #tpu.memory_space<vmem>>, vector<1x1x256xf32>
    tpu.vector_store %arg5[%c0_19, %c0_20, %c0_21], %40 {strides = array<i32>} : memref<1x1x256xf32, #tpu.memory_space<vmem>>, vector<1x1x256xf32>,
    return
  }
  func.func @transform_0(%arg0: i32, %arg1: i32, %arg2: i32) -> (i32, i32, i32) {
    %c1_i32 = arith.constant 1 : i32
    %0 = arith.muli %arg1, %c1_i32 : i32
    %1 = arith.addi %0, %arg2 : i32
    %c0_i32 = arith.constant 0 : i32
    %c0_i32_0 = arith.constant 0 : i32
    return %arg0, %c0_i32, %1 : i32, i32, i32
  }
  func.func @transform_1(%arg0: i32, %arg1: i32, %arg2: i32) -> (i32, i32, i32) {
    %c1_i32 = arith.constant 1 : i32
    %0 = arith.muli %arg1, %c1_i32 : i32
    %1 = arith.addi %0, %arg2 : i32
    %c0_i32 = arith.constant 0 : i32
    %c0_i32_0 = arith.constant 0 : i32
    return %arg0, %c0_i32, %1 : i32, i32, i32
  }
  func.func @transform_2(%arg0: i32, %arg1: i32, %arg2: i32) -> (i32, i32, i32) {
    %c1_i32 = arith.constant 1 : i32
    %0 = arith.muli %arg0, %c1_i32 : i32
    %1 = arith.addi %0, %arg1 : i32
    %c0_i32 = arith.constant 0 : i32
    %c0_i32_0 = arith.constant 0 : i32
    %c0_i32_1 = arith.constant 0 : i32
    return %1, %c0_i32, %c0_i32_0 : i32, i32, i32
  }
}

</mosaic_0001>

<bundles_post_ra>
// kernel: tpu_custom_call.1
= control target key start
LH: loop header
LB: loop body
LE: loop exit
PB: predicated region body
PF: predicated region fallthrough
CT: control target
= control target key end

     0   :  { %7 = vsyncpa [#allocation3], 0  ;;  %s995_s0 = inlined_call_operand.hbm [shape: f32[2,4,256], index: 0, kind: input, shape index: {}]   ;;  %s996_s1 = inlined_call_operand.hbm [shape: s32[2,1,256], index: 1, kind: input, shape index: {}]   ;;  %s997_s2 = inlined_call_operand.hbm [shape: f32[2,1,256], index: 2, kind: output, shape index: {}]  }
   0x1   :  { %9 = vsyncpa [#allocation3 + $0x1], 0 }
   0x2   :  { %10 = vsyncpa [#allocation6], 0 }
   0x3   :  { %12 = vsyncpa [#allocation6 + $0x1], 0 }
   0x4   :  { %13 = vsyncpa [#allocation4], 0 }
   0x5   :  { %15 = vsyncpa [#allocation4 + $0x1], 0  ;;  %s788_s9 = smov 0   ;;  %s790_s10 = smov 0  }
   0x6   :  { %s792_s11 = smov 0   ;;  %s794_s12 = smov 0  }
   0x7   :  { %s796_s13 = smov 0   ;;  %s798_s14 = smov 0  }
   0x8 LB: > { %s524_s15 = sadd.s32 4294967295, %s766_s14   ;;  %s525_s16 = sadd.s32 4294967294, %s766_s14   ;;  %s766_s14 = sphi %s798_s14, %s21_s14   ;;  %s762_s13 = sphi %s796_s13, %s1011_s13   ;;  %s758_s12 = sphi %s794_s12, %s1010_s12   ;;  %s754_s11 = sphi %s792_s11, %s1009_s11   ;;  %s750_s10 = sphi %s790_s10, %s1008_s10   ;;  %s746_s9 = sphi %s788_s9, %s1007_s9  }
   0x9   : > { %s40_s17 = sadd.s32 1, %s762_s13  ;;  %s51_s18 = sadd.s32 1, %s754_s11 }
   0xa   : > { %p42_p0 = scmp.ge.s32.totalorder %s40_s17, 2  ;;  %p58_p1 = scmp.ne.s32.totalorder %s754_s11, %s750_s10 }
   0xb   : > { %p59_p2 = scmp.eq.s32.totalorder %s766_s14, 0  ;;  %p64_p3 = scmp.ne.s32.totalorder %s750_s10, %s746_s9 }
   0xc   : > { %s1013_s17 = smov (%p42_p0, %s40_s17), 0  ;;  %p65_p5 = scmp.eq.s32.totalorder %s524_s15, 0 }
   0xd   : > { %p829_p4 = por %p59_p2, %p58_p1  ;;  %s46_s20 = ssub.s32 %s762_s13, %s1013_s17 }
   0xe   : > { %p120_p6 = scmp.eq.s32.totalorder %s524_s15, 1  ;;  %p49_p7 = scmp.eq.s32.totalorder %s46_s20, 0 }
   0xf   : > { %p835_p8 = por %p65_p5, %p64_p3  ;;  %p126_p10 = scmp.eq.s32.totalorder %s525_s16, 1 }
  0x10   : > { %p839_p9 = por %p120_p6, %p58_p1  ;;  %p563_p13 = scmp.lt.s32.totalorder %s766_s14, 2 }
  0x11   : > { %s844_s23 = scalar_select %p49_p7, %s754_s11, %s51_s18  }
  0x12   : > { %p846_p11 = por %p126_p10, %p64_p3  ;;  %s853_s25 = sand.u32 1, %s754_s11  }
  0x13   : > { %s528_s26 = sshll.u32 %s853_s25, 3  ;;  %s543_s27 = sshll.u32 %s762_s13, 7 }
  0x14   : > { %s159_s30 = scalar_lea.hbm %s995_s0, %s543_s27  ;;  %s150_s3 = scalar_lea.vmem [#allocation2], %s528_s26 }
  0x15   : > { %s161_s4 = sshll.u32 %s150_s3, 4  ;;  %p862_p0 = pnand %p563_p13, %p829_p4  ;;  %s162_s4 = int_to_ptr.vmem [resolvable:$true] %s161_s4 }
  0x16   : > { %p534_p1 = scmp.ge.s32.totalorder %s766_s14, 1  ;;  %p188_p2 = scmp.lt.s32.totalorder %s766_s14, 3 }
  0x17   : > { %s147_s6 = scalar_lea.sflag [#allocation3], %s853_s25  ;;  %p628_p3 = pneg %p862_p0 }
  0x18   : > { %s639_s7 = scalar_lea.vmem %s162_s4, 128  ;;  %s768_s8 = smov [#allocation2]  }
  0x19   : > { %p640_p5 = scmp.ne.s32.totalorder %s162_s4, %s639_s7  ;;  %s644_s15 = sshll.u32 %s768_s8, 4  ;;  %s645_s15 = int_to_ptr.vmem [resolvable:$false] %s644_s15 }
  0x1a   : > { %s646_s16 = scalar_lea.vmem %s645_s15, 256  ;;  %p647_p4 = scmp.lt.s32.totalorder %s162_s4, %s645_s15 }
  0x1b   : > { %p642_p6 = pnand %p640_p5, %p628_p3  ;;  %p648_p10 = scmp.lt.s32.totalorder %s646_s16, %s639_s7 }
  0x1d   : > { %p643_p7 = pneg %p642_p6  ;;  %p649_p13 = por %p648_p10, %p647_p4 }
  0x1f   : > { %p650_p12 = pnand %p649_p13, %p643_p7 }
  0x21   : > { %653 = shalt.err (!%p650_p12)
}
  0x22   : > { %555 = dma.hbm_to_vmem [thread:$0]  (!%p862_p0), %s159_s30, 128, %s162_s4, %s147_s6  }
  0x23   : > { %p880_p5 = pnand %p534_p1, %p188_p2  ;;  %s531_s19 = sshll.u32 %s853_s25, 1 }
  0x24   : > { %s544_s20 = sshll.u32 %s762_s13, 5  ;;  %s172_s29 = scalar_lea.vmem [#allocation5], %s531_s19 }
  0x25   : > { %s181_s28 = scalar_lea.hbm %s996_s1, %s544_s20  ;;  %s183_s3 = sshll.u32 %s172_s29, 4  ;;  %s184_s3 = int_to_ptr.vmem [resolvable:$true] %s183_s3 }
  0x26   : > { %s169_s7 = scalar_lea.sflag [#allocation6], %s853_s25  ;;  %s667_s8 = scalar_lea.vmem %s184_s3, 32 }
  0x27   : > { %p668_p12 = scmp.ne.s32.totalorder %s184_s3, %s667_s8  ;;  %s769_s30 = smov [#allocation5]  }
  0x28   : > { %s672_s4 = sshll.u32 %s769_s30, 4  ;;  %s673_s4 = int_to_ptr.vmem [resolvable:$false] %s672_s4 }
  0x29   : > { %p670_p6 = pnand %p668_p12, %p628_p3  ;;  %s674_s6 = scalar_lea.vmem %s673_s4, 64 }
  0x2a   : > { %p675_p1 = scmp.lt.s32.totalorder %s184_s3, %s673_s4  ;;  %p676_p2 = scmp.lt.s32.totalorder %s674_s6, %s667_s8 }
  0x2b   : > { %p671_p7 = pneg %p670_p6 }
  0x2c   : > { %p677_p4 = por %p676_p2, %p675_p1 }
  0x2e   : > { %p678_p10 = pnand %p677_p4, %p671_p7 }
  0x30   : > { %681 = shalt.err (!%p678_p10)
}
  0x31   : > { %558 = dma.hbm_to_vmem [thread:$0]  (!%p862_p0), %s181_s28, 32, %s184_s3, %s169_s7  }
  0x32   : > { %192 = sbr.rel (%p880_p5) target bundleno = 180 (0xb4), region = 28  ;;  %s898_s25 = sand.u32 (!%p880_p5), 1, %s750_s10  }
  0x33   : > { %s535_s15 = sshll.u32 (!%p880_p5), %s898_s25, 3  ;;  %s195_s16 = scalar_lea.sflag (!%p880_p5), [#allocation3], %s898_s25 }
  0x34   : > { %s198_s19 = scalar_lea.vmem (!%p880_p5), [#allocation2], %s535_s15 }
  0x37   : > { %733 = dma.done.wait (%p835_p8), %s195_s16, 128  }
  0x38   : > { %735 = vsyncadd (%p835_p8), %s195_s16, 4294967168  ;;  %s536_s5 = sshll.u32 %s898_s25, 1  ;;  %s204_s18 = scalar_lea.sflag [#allocation6], %s898_s25 }
  0x39   : > { %s908_s20 = scalar_lea.vmem [#allocation5], %s536_s5 }
  0x3a   : > { %737 = dma.done.wait (%p835_p8), %s204_s18, 32  }
  0x3b   : > { %739 = vsyncadd (%p835_p8), %s204_s18, 4294967264  ;;  %v242_v0 = vlaneseq  ;;  %s918_s26 = scalar_lea.vmem [#allocation7], %s536_s5  ;;  %v770_v2 = vmov 0.0   ;;  %vm252_vm1 = vcmask 1043456   ;;  %v247_v3 = vld [vmem:[%s198_s19] sm:$0xff]  ;;  %s545_s21 = sshll.u32 %s758_s12, 5 }
  0x3c   : > { %v250_v4 = vcombine.high %v247_v3, %v247_v3  ;;  %v253_v5 = vsel %vm252_vm1, %v247_v3, -inf  ;;  %v929_v24 = vld [vmem:[%s908_s20] sm:$0x3]  ;;  %s411_s27 = sshll.u32 %s918_s26, 4  ;;  %s409_s3 = scalar_lea.hbm %s997_s2, %s545_s21  ;;  %s412_s27 = int_to_ptr.vmem [resolvable:$true] %s411_s27 }
  0x3d   : > { %vm914_vm0 = vcmp.lt.s32.totalorder %v242_v0, 256  ;;  %v254_v6 = vrot.slane %v253_v5, 4  ;;  %v925_v22 = vshrl.u32 %v242_v0, 7  ;;  %vm327_vm4 = vcmp.ne.s32.totalorder %v929_v24, 255  ;;  %s396_s7 = scalar_lea.sflag [#allocation4], %s898_s25  ;;  %s682_s8 = scalar_lea.vmem %s412_s27, 32 }
  0x3e   : > { %246 = vst.msk [vmem:[%s918_s26] sm:$0x3] %vm914_vm0, %v770_v2  ;;  %v260_v7 = vsel %vm252_vm1, %v250_v4, -inf  ;;  %p683_p8 = scmp.ne.s32.totalorder %s412_s27, %s682_s8  ;;  %s772_s30 = smov [#allocation7]  }
  0x3f   : > { %v255_v8 = vmax.f32 %v253_v5, %v254_v6  ;;  %v261_v9 = vrot.slane %v260_v7, 4  ;;  %v295_v23 = vsub.s32 0, %v925_v22  ;;  %v299_v25 = vsub.s32 1, %v925_v22  ;;  %s686_s4 = sshll.u32 %s772_s30, 4  ;;  %s687_s4 = int_to_ptr.vmem [resolvable:$false] %s686_s4 }
  0x40   : > { %v771_v5 = vmov 1966171168   ;;  %p684_p0 = pnand %p683_p8, %p839_p9  ;;  %s688_s12 = scalar_lea.vmem %s687_s4, 64 }
  0x41   : > { %v256_v10 = vrot.slane %v255_v8, 2  ;;  %v262_v11 = vmax.f32 %v260_v7, %v261_v9  ;;  %v296_v26 = vrot.slane %v929_v24, %v295_v23  ;;  %v300_v27 = vrot.slane %v929_v24, %v299_v25  ;;  %p689_p13 = scmp.lt.s32.totalorder %s412_s27, %s687_s4  ;;  %p690_p5 = scmp.lt.s32.totalorder %s688_s12, %s682_s8 }
  0x42   : > { %v338_v6 = vunpack.c.l.s4 %v771_v5  ;;  %p685_p3 = pneg %p684_p0 }
  0x43   : > { %v257_v12 = vmax.f32 %v255_v8, %v256_v10  ;;  %v263_v13 = vrot.slane %v262_v11, 2  ;;  %vm301_vm2 = vcmp.eq.s32.totalorder %v925_v22, %v296_v26  ;;  %vm302_vm3 = vcmp.eq.s32.totalorder %v925_v22, %v300_v27  ;;  %p691_p12 = por %p690_p5, %p689_p13 }
  0x44   : > { %v339_v9 = vunpack.c.0.s8 %v338_v6 }
  0x45   : > { %v258_v14 = vrot.slane %v257_v12, 1  ;;  %v264_v15 = vmax.f32 %v262_v11, %v263_v13  ;;  %p692_p6 = pnand %p691_p12, %p685_p3 }
  0x47   : > { %v259_v16 = vmax.f32 %v257_v12, %v258_v14  ;;  %v265_v17 = vrot.slane %v264_v15, 1  ;;  %v342_v14 = vsub.s32 %v339_v9, %v925_v22 }
  0x49   : > { %v266_v18 = vmax.f32 %v264_v15, %v265_v17 }
  0x4b   : > { %v269_v19 = vcombine.low %v259_v16, %v266_v18 }
  0x4d   : > { %v271_v20 = vsub.f32 %v247_v3, %v269_v19 }
  0x4f   : > { %v272_v21 = vmul.f32 1.442695, %v271_v20 }
  0x51   : > { %616 = vpow2.f32 %v272_v21 }
  0x5e   : > { %v617_v28 = vpop.eup %616 }
  0x5f   : > { %v275_v29 = vcombine.high %v617_v28, %v617_v28  ;;  %v277_v30 = vsel %vm252_vm1, %v617_v28, 0.0  ;;  %v303_v31 = vsel %vm301_vm2, %v617_v28, 0.0 }
  0x60   : > { %v278_v32 = vrot.slane %v277_v30, 4  ;;  %v305_v33 = vsel %vm252_vm1, %v303_v31, 0.0 }
  0x61   : > { %v284_v34 = vsel %vm252_vm1, %v275_v29, 0.0  ;;  %v304_v35 = vsel %vm302_vm3, %v275_v29, 0.0  ;;  %v306_v38 = vrot.slane %v305_v33, 4 }
  0x62   : > { %v279_v36 = vadd.f32 %v278_v32, %v277_v30  ;;  %v285_v37 = vrot.slane %v284_v34, 4  ;;  %v312_v39 = vsel %vm252_vm1, %v304_v35, 0.0 }
  0x63   : > { %v313_v42 = vrot.slane %v312_v39, 4  ;;  %v307_v45 = vadd.f32 %v306_v38, %v305_v33  ;;  %v370_v33 = vld [vmem:[%s918_s26] sm:$0x3] }
  0x64   : > { %v280_v40 = vrot.slane %v279_v36, 2  ;;  %v286_v41 = vadd.f32 %v285_v37, %v284_v34 }
  0x65   : > { %v314_v48 = vadd.f32 %v313_v42, %v312_v39  ;;  %v308_v51 = vrot.slane %v307_v45, 2 }
  0x66   : > { %v281_v43 = vadd.f32 %v280_v40, %v279_v36  ;;  %v287_v44 = vrot.slane %v286_v41, 2 }
  0x67   : > { %v315_v53 = vrot.slane %v314_v48, 2  ;;  %v309_v54 = vadd.f32 %v308_v51, %v307_v45 }
  0x68   : > { %v282_v46 = vrot.slane %v281_v43, 1  ;;  %v288_v47 = vadd.f32 %v287_v44, %v286_v41 }
  0x69   : > { %v316_v55 = vadd.f32 %v315_v53, %v314_v48  ;;  %v310_v56 = vrot.slane %v309_v54, 1 }
  0x6a   : > { %v283_v49 = vadd.f32 %v282_v46, %v281_v43  ;;  %v289_v50 = vrot.slane %v288_v47, 1 }
  0x6b   : > { %v317_v57 = vrot.slane %v316_v55, 1  ;;  %v311_v58 = vadd.f32 %v310_v56, %v309_v54 }
  0x6c   : > { %v290_v52 = vadd.f32 %v289_v50, %v288_v47  ;;  %618 = vrcp.f32 %v283_v49 }
  0x6d   : > { %v318_v59 = vadd.f32 %v317_v57, %v316_v55 }
  0x6e   : > { %620 = vrcp.f32 %v290_v52 }
  0x79   : > { %v619_v60 = vpop.eup %618 }
  0x7a   : > { %v320_v61 = vmul.f32 %v619_v60, %v311_v58 }
  0x7b   : > { %v621_v62 = vpop.eup %620 }
  0x7c   : > { %v322_v63 = vmul.f32 %v621_v62, %v318_v59  ;;  %v323_v0 = vmax.f32 %v320_v61, 1e-37 }
  0x7e   : > { %v324_v2 = vmax.f32 %v322_v63, 1e-37  ;;  %v325_v3 = vmin.f32 %v323_v0, 1.0 }
  0x80   : > { %v326_v4 = vmin.f32 %v324_v2, 1.0  ;;  %622 = vlog2.f32 %v325_v3  ;;  %v353_v16 = vsub.f32 1.0, %v325_v3 }
  0x82   : > { %624 = vlog2.f32 %v326_v4  ;;  %v354_v17 = vsub.f32 1.0, %v326_v4  ;;  %v355_v20 = vmul.f32 %v353_v16, %v353_v16 }
  0x84   : > { %v356_v21 = vmul.f32 %v354_v17, %v354_v17 }
  0x8d   : > { %v623_v7 = vpop.eup %622 }
  0x8e   : > { %v329_v8 = vmul.f32 0.6931472, %v623_v7 }
  0x8f   : > { %v625_v10 = vpop.eup %624 }
  0x90   : > { %v331_v11 = vmul.f32 0.6931472, %v625_v10  ;;  %v332_v12 = vsub.f32 0.0, %v329_v8 }
  0x92   : > { %v333_v13 = vsub.f32 0.0, %v331_v11 }
  0x94   : > { %v336_v15 = vcombine.low %v332_v12, %v333_v13 }
  0x96   : > { %v343_v18 = vrot.slane %v336_v15, %v342_v14 }
  0x98   : > { %v350_v19 = vrot.slane %v343_v18, %v342_v14 }
  0x9a   : > { %v352_v26 = vsel %vm327_vm4, %v350_v19, 0.0 }
  0x9b   : > { %v361_v27 = vrot.slane %v352_v26, %v295_v23  ;;  %v365_v28 = vrot.slane %v352_v26, %v299_v25 }
  0x9d   : > { %v368_v29 = vmul.f32 %v361_v27, %v355_v20  ;;  %v369_v30 = vmul.f32 %v365_v28, %v356_v21 }
  0x9f   : > { %v373_v31 = vcombine.low %v368_v29, %v369_v30 }
  0xa1   : > { %v380_v32 = vrot.slane %v373_v31, %v342_v14 }
  0xa3   : > { %v387_v24 = vrot.slane %v380_v32, %v342_v14 }
  0xa5   : > { %v389_v34 = vadd.f32 %v387_v24, %v370_v33 }
  0xa7   : > { %394 = vst.msk [vmem:[%s918_s26] sm:$0x3] %vm914_vm0, %v389_v34 }
  0xa8   : > { %695 = shalt.err (!%p692_p6)
}
  0xa9   : > { %s696_s6 = scalar_lea.hbm %s409_s3, 32  ;;  %s700_s16 = scalar_lea.hbm %s997_s2, 64 }
  0xaa   : > { %p697_p7 = scmp.ne.s32.totalorder %s409_s3, %s696_s6  ;;  %p701_p4 = scmp.lt.s32.totalorder %s409_s3, %s997_s2 }
  0xab   : > { %p702_p10 = scmp.lt.s32.totalorder %s700_s16, %s696_s6 }
  0xac   : > { %p698_p1 = pnand %p697_p7, %p839_p9 }
  0xad   : > { %p703_p8 = por %p702_p10, %p701_p4 }
  0xae   : > { %p699_p2 = pneg %p698_p1 }
  0xb0   : > { %p704_p0 = pnand %p703_p8, %p699_p2 }
  0xb2   : > { %707 = shalt.err (!%p704_p0)
}
  0xb3   : > { %550 = dma.vmem_to_hbm [thread:$0]  (%p839_p9), %s412_s27, 32, %s409_s3, %s396_s7  }
  0xb4 PF: > { %s423_s18 = sand.u32 1, %s746_s9   ;;  %p1006_p3 = scmp.ge.s32.totalorder %s766_s14, 2 }
  0xb5   : > { %s424_s20 = scalar_lea.sflag [#allocation4], %s423_s18 }
  0xb6   : > { %p560_p13 = pnand %p1006_p3, %p846_p11 }
  0xb8   : > { %p561_p5 = pneg %p560_p13 }
  0xba   : > { %741 = dma.done.wait (%p561_p5), %s424_s20, 32  }
  0xbb   : > { %743 = vsyncadd (%p561_p5), %s424_s20, 4294967264  ;;  %s21_s14 = sadd.s32 1, %s766_s14   ;;  %s1007_s9 = smov %s750_s10 }
  0xbc   : > { %p18_p12 = scmp.ge.s32.totalorder %s21_s14, 4   ;;  %s1008_s10 = smov %s754_s11 }
  0xbd   : > { %s1009_s11 = smov %s844_s23  ;;  %s1010_s12 = smov %s762_s13 }
  0xbe   : > { %s1011_s13 = smov %s1013_s17  ;;  %20 = sbr.rel (!%p18_p12) target bundleno = 8 (0x8), region = 90 }
  0xc3   :  { %429 = vsyncpa [#allocation3], 1 }
  0xc4   :  { %431 = vsyncpa [#allocation3 + $0x1], 1 }
  0xc5   :  { %432 = vsyncpa [#allocation6], 1 }
  0xc6   :  { %434 = vsyncpa [#allocation6 + $0x1], 1 }
  0xc7   :  { %435 = vsyncpa [#allocation4], 1 }
  0xc8   :  { %437 = vsyncpa [#allocation4 + $0x1], 1 }

</bundles_post_ra>
